<compile_context>
chip_gen: v6e
topology: v6e:2x2x1
jax: 0.10.0
libtpu: 0.0.40
codegen_flags: <defaults>
</compile_context>

<pallas_src>
import jax
import jax.numpy as jnp
from jax.experimental import pallas as pl
from jax.experimental.pallas import tpu as pltpu


def _rnn_prediction_kernel(
    xs_ref,                      # (T*BP, I) bf16, both sequences, time-major, batch-stacked+padded
    h0_ref, c0_ref,              # (BP, 4H) f32, initial state, valid in rows [0,2B) lanes [0,H)
    wp_ref, bp_ref,              # projection Linear: (I, H) bf16, (1, H) f32
    wih_ref, bl_ref,             # LSTM input path: (H, 4H) bf16, (1, 4H) f32 (b_ih+b_hh, g-cols x2)
    whh_ref,                     # LSTM recurrent: (4H, 4H) bf16, rows [H,4H) zero, g-cols x2
    w1a_ref, w1b_ref, b1_ref,    # fc1 halves: (4H, H) f32 zero-padded rows, bias (1, H) f32
    w2_ref, b2_ref,              # fc2: (H, 3) f32, (1, 3) f32
    out_ref,                     # (B, 3) f32 softmax probabilities
):
    BP = h0_ref.shape[0]                    # padded stacked batch (multiple of 8)
    H = wp_ref.shape[1]
    B = out_ref.shape[0]
    T = xs_ref.shape[0] // BP

    # ---- hoisted input-path matmuls for ALL timesteps of BOTH sequences (bf16 MXU) ----
    xp = jnp.tanh(
        jnp.dot(xs_ref[...], wp_ref[...], preferred_element_type=jnp.float32)
        + bp_ref[...]
    )                                                               # (T*BP, H) f32
    pre = (
        jnp.dot(xp.astype(jnp.bfloat16), wih_ref[...],
                preferred_element_type=jnp.float32)
        + bl_ref[...]
    )                                                               # (T*BP, 4H) f32
    pre = pre.reshape(T, BP, 4 * H)                                 # tile-aligned reshape

    whh = whh_ref[...]
    h = h0_ref[...]                                                 # (BP, 4H) f32
    c = c0_ref[...]

    # ---- recurrence: statically unrolled (T small); only h@W_hh + gates on serial path ----
    for t in range(T):
        gates = pre[t] + jnp.dot(
            h.astype(jnp.bfloat16), whh, preferred_element_type=jnp.float32
        )                                                           # (BP, 4H): [i|f|2g|o]
        sig = jax.nn.sigmoid(gates)                                 # one full-width EUP op
        f_al = pltpu.roll(sig, shift=3 * H, axis=1)                 # sigmoid(f) -> lanes [0,H)
        g_al = 2.0 * pltpu.roll(sig, shift=2 * H, axis=1) - 1.0     # tanh(g)=2*sigmoid(2g)-1
        o_al = pltpu.roll(sig, shift=H, axis=1)                     # sigmoid(o) -> lanes [0,H)
        c = f_al * c + sig * g_al                                   # valid in lanes [0,H)
        h = o_al * jnp.tanh(c)                                      # junk lanes stay bounded,
                                                                    # killed by zero W_hh rows

    # ---- head (f32): relu(h1@W1a + h2@W1b + b1) -> fc2 -> softmax(dim=1) ----
    z = jnp.maximum(
        jnp.dot(h[0:B], w1a_ref[...], preferred_element_type=jnp.float32)
        + jnp.dot(h[B:2 * B], w1b_ref[...], preferred_element_type=jnp.float32)
        + b1_ref[...],
        0.0,
    )                                                               # (B, H)
    logits = (
        jnp.dot(z, w2_ref[...], preferred_element_type=jnp.float32) + b2_ref[...]
    )                                                               # (B, 3)
    m = jnp.max(logits, axis=1, keepdims=True)
    e = jnp.exp(logits - m)
    out_ref[...] = e / jnp.sum(e, axis=1, keepdims=True)


def prepare_params(params):
    """One-time: pad/scale/cast weights into kernel-ready form (hoisted out of the call)."""
    H = params["wih"].shape[0]
    H4 = 4 * H
    # Scale g-gate columns by 2 so tanh(g) = 2*sigmoid(2g) - 1 needs no extra EUP op.
    gscale = jnp.ones((1, H4), jnp.float32).at[:, 2 * H:3 * H].set(2.0)
    wih_s = params["wih"] * gscale
    whh_s = params["whh"] * gscale
    bl_s = params["bl"] * gscale
    # Zero-pad W_hh rows so junk lanes [H,4H) of the padded state never reach the gates.
    whh_pad = jnp.zeros((H4, H4), jnp.float32).at[:H, :].set(whh_s)
    # Split W1 into zero-padded halves: replaces torch.cat((h1, h2), dim=1).
    w1a = jnp.zeros((H4, H), jnp.float32).at[:H, :].set(params["w1"][:H])
    w1b = jnp.zeros((H4, H), jnp.float32).at[:H, :].set(params["w1"][H:])
    return {
        "wp": params["wp"].astype(jnp.bfloat16),
        "bp": params["bp"],
        "wih": wih_s.astype(jnp.bfloat16),
        "bl": bl_s,
        "whh": whh_pad.astype(jnp.bfloat16),
        "w1a": w1a,
        "w1b": w1b,
        "b1": params["b1"],
        "w2": params["w2"],
        "b2": params["b2"],
    }


def rnn_prediction_net(prep, hist1, hist2, hidden1, hidden2):
    """hist1/hist2: (T, B, I); hidden: (h, c) each of shape (1, B, H); prep: prepare_params(...)."""
    h1_0, c1_0 = hidden1
    h2_0, c2_0 = hidden2
    B = h1_0.shape[1]
    H = prep["wp"].shape[1]
    H4 = 4 * H
    T1, T2 = hist1.shape[0], hist2.shape[0]
    I = hist1.shape[2]

    if T1 == 0 or T2 == 0:
        # TODO(synk): empty-sequence branch (returns h[-1]) handled outside the kernel.
        raise NotImplementedError("empty history sequence not exercised here")
    if T1 != T2:
        # TODO(synk): unequal-length histories would need two separate recurrences.
        raise NotImplementedError("merged-encoder kernel assumes len(hist1) == len(hist2)")

    T = T1
    B2 = 2 * B
    BP = ((B2 + 7) // 8) * 8    # pad stacked batch to whole (8,128) sublane tiles

    # Stack the two sequences along batch, pad to BP rows, flatten time into rows.
    x = jnp.concatenate([hist1, hist2], axis=1)                     # (T, 2B, I)
    x = jnp.pad(x, ((0, 0), (0, BP - B2), (0, 0)))                  # (T, BP, I)
    xs_flat = x.reshape(T * BP, I).astype(jnp.bfloat16)

    # Stacked, padded initial state: valid data in rows [0,2B), lanes [0,H).
    h0 = jnp.pad(jnp.concatenate([h1_0[0], h2_0[0]], axis=0), ((0, BP - B2), (0, H4 - H)))
    c0 = jnp.pad(jnp.concatenate([c1_0[0], c2_0[0]], axis=0), ((0, BP - B2), (0, H4 - H)))

    inputs = (
        xs_flat, h0, c0,
        prep["wp"], prep["bp"],
        prep["wih"], prep["bl"],
        prep["whh"],
        prep["w1a"], prep["w1b"], prep["b1"],
        prep["w2"], prep["b2"],
    )
    vmem = pl.BlockSpec(memory_space=pltpu.MemorySpace.VMEM)
    return pl.pallas_call(
        _rnn_prediction_kernel,
        out_shape=jax.ShapeDtypeStruct((B, 3), jnp.float32),
        in_specs=[vmem] * len(inputs),
        out_specs=vmem,
    )(*inputs)


def init_params(key, input_size, hidden_size):
    """Deterministic PyTorch-style uniform init; weights pre-transposed to (in, out)."""
    ks = jax.random.split(key, 12)

    def u(k, shape, fan_in):
        bound = 1.0 / jnp.sqrt(fan_in)
        return jax.random.uniform(k, shape, jnp.float32, -bound, bound)

    I, H = input_size, hidden_size
    params = {
        # project = Linear(I, H) (+ Tanh applied in kernel)
        "wp": u(ks[0], (I, H), I),
        "bp": u(ks[1], (1, H), I),
        # LSTM(H, H, 1): weight_ih (4H, H), weight_hh (4H, H), biases (4H,)
        "wih": u(ks[2], (H, 4 * H), H),
        "whh": u(ks[3], (H, 4 * H), H),
        "bl": u(ks[4], (1, 4 * H), H) + u(ks[5], (1, 4 * H), H),  # b_ih + b_hh
        # prediction: Linear(2H, H) -> ReLU -> Linear(H, 3) -> Softmax
        "w1": u(ks[6], (2 * H, H), 2 * H),
        "b1": u(ks[7], (1, H), 2 * H),
        "w2": u(ks[8], (H, 3), H),
        "b2": u(ks[9], (1, 3), H),
    }
    return params


def _reference(params, hist1, hist2, hidden1, hidden2):
    """Pure-JAX f32 reference mirroring the PyTorch forward, for verification."""
    H = params["whh"].shape[0]

    def encode(seq, h, c):
        h = h[0]
        c = c[0]
        for t in range(seq.shape[0]):
            xp = jnp.tanh(seq[t] @ params["wp"] + params["bp"])
            g = xp @ params["wih"] + h @ params["whh"] + params["bl"]
            i_g = jax.nn.sigmoid(g[:, 0:H])
            f_g = jax.nn.sigmoid(g[:, H:2 * H])
            g_g = jnp.tanh(g[:, 2 * H:3 * H])
            o_g = jax.nn.sigmoid(g[:, 3 * H:4 * H])
            c = f_g * c + i_g * g_g
            h = o_g * jnp.tanh(c)
        return h

    h1 = encode(hist1, *hidden1)
    h2 = encode(hist2, *hidden2)
    t = jnp.concatenate([h1, h2], axis=1)
    z = jnp.maximum(t @ params["w1"] + params["b1"], 0.0)
    logits = z @ params["w2"] + params["b2"]
    return jax.nn.softmax(logits, axis=1)


if __name__ == "__main__":
    B = 2            # batch
    I = 8            # history_input_size
    H = 32           # rnn_hidden_size
    T = 8            # sequence length

    key = jax.random.PRNGKey(0)
    kp, k1, k2 = jax.random.split(key, 3)
    params = init_params(kp, I, H)
    prep = prepare_params(params)            # one-time kernel-ready weights

    hist1 = jax.random.normal(k1, (T, B, I), jnp.float32)
    hist2 = jax.random.normal(k2, (T, B, I), jnp.float32)
    # _init_hidden: zeros of (num_layers=1, B, H)
    hidden1 = (jnp.zeros((1, B, H), jnp.float32), jnp.zeros((1, B, H), jnp.float32))
    hidden2 = (jnp.zeros((1, B, H), jnp.float32), jnp.zeros((1, B, H), jnp.float32))

    fwd = jax.jit(rnn_prediction_net)
    out = fwd(prep, hist1, hist2, hidden1, hidden2)
    out = jax.block_until_ready(out)

    ref = _reference(params, hist1, hist2, hidden1, hidden2)
    assert out.shape == (B, 3)
    assert jnp.allclose(jnp.sum(out, axis=1), 1.0, atol=1e-5)
    # bf16 MXU operands -> relaxed tolerance vs. the f32 reference.
    assert jnp.allclose(out, ref, atol=2e-2, rtol=2e-2)
    print("KERNEL_OK")
</pallas_src>

<mosaic_0001>
module attributes {stable_mosaic.version = 11 : i64} {
  func.func @_rnn_prediction_kernel(%arg0: memref<64x8xbf16, #tpu.memory_space<vmem>>, %arg1: memref<8x128xf32, #tpu.memory_space<vmem>>, %arg2: memref<8x128xf32, #tpu.memory_space<vmem>>, %arg3: memref<8x32xbf16, #tpu.memory_space<vmem>>, %arg4: memref<1x32xf32, #tpu.memory_space<vmem>>, %arg5: memref<32x128xbf16, #tpu.memory_space<vmem>>, %arg6: memref<1x128xf32, #tpu.memory_space<vmem>>, %arg7: memref<128x128xbf16, #tpu.memory_space<vmem>>, %arg8: memref<128x32xf32, #tpu.memory_space<vmem>>, %arg9: memref<128x32xf32, #tpu.memory_space<vmem>>, %arg10: memref<1x32xf32, #tpu.memory_space<vmem>>, %arg11: memref<32x3xf32, #tpu.memory_space<vmem>>, %arg12: memref<1x3xf32, #tpu.memory_space<vmem>>, %arg13: memref<2x3xf32, #tpu.memory_space<vmem>>) attributes {dimension_semantics = [], scalar_prefetch = 0 : i64, scratch_operands = 0 : i64, tpu.core_type = #tpu.core_type<tc>} {
    %c0 = arith.constant 0 : index
    %c0_0 = arith.constant 0 : index
    %0 = vector.load %arg0[%c0, %c0_0] : memref<64x8xbf16, #tpu.memory_space<vmem>>, vector<64x8xbf16>
    %c0_1 = arith.constant 0 : index
    %c0_2 = arith.constant 0 : index
    %1 = vector.load %arg3[%c0_1, %c0_2] : memref<8x32xbf16, #tpu.memory_space<vmem>>, vector<8x32xbf16>
    %cst = arith.constant dense<0.000000e+00> : vector<64x32xf32>
    %2 = tpu.matmul %0, %1, %cst {dimension_numbers = #tpu.dot_dimension_numbers<[1], [0], [0], [1], [0, 0, 1, 1], [], []>} : vector<64x8xbf16>, vector<8x32xbf16>, vector<64x32xf32> -> vector<64x32xf32>
    %c0_3 = arith.constant 0 : index
    %c0_4 = arith.constant 0 : index
    %3 = vector.load %arg4[%c0_3, %c0_4] : memref<1x32xf32, #tpu.memory_space<vmem>>, vector<1x32xf32>
    %4 = vector.broadcast %3 : vector<1x32xf32> to vector<64x32xf32>
    %5 = arith.addf %2, %4 : vector<64x32xf32>
    %6 = math.tanh %5 : vector<64x32xf32>
    %7 = arith.truncf %6 : vector<64x32xf32> to vector<64x32xbf16>
    %c0_5 = arith.constant 0 : index
    %c0_6 = arith.constant 0 : index
    %8 = vector.load %arg5[%c0_5, %c0_6] : memref<32x128xbf16, #tpu.memory_space<vmem>>, vector<32x128xbf16>
    %cst_7 = arith.constant dense<0.000000e+00> : vector<64x128xf32>
    %9 = tpu.matmul %7, %8, %cst_7 {dimension_numbers = #tpu.dot_dimension_numbers<[1], [0], [0], [1], [0, 0, 1, 1], [], []>} : vector<64x32xbf16>, vector<32x128xbf16>, vector<64x128xf32> -> vector<64x128xf32>
    %c0_8 = arith.constant 0 : index
    %c0_9 = arith.constant 0 : index
    %10 = vector.load %arg6[%c0_8, %c0_9] : memref<1x128xf32, #tpu.memory_space<vmem>>, vector<1x128xf32>
    %11 = vector.broadcast %10 : vector<1x128xf32> to vector<64x128xf32>
    %12 = arith.addf %9, %11 : vector<64x128xf32>
    %13 = vector.shape_cast %12 : vector<64x128xf32> to vector<8x8x128xf32>
    %c0_10 = arith.constant 0 : index
    %c0_11 = arith.constant 0 : index
    %14 = vector.load %arg7[%c0_10, %c0_11] : memref<128x128xbf16, #tpu.memory_space<vmem>>, vector<128x128xbf16>
    %c0_12 = arith.constant 0 : index
    %c0_13 = arith.constant 0 : index
    %15 = vector.load %arg1[%c0_12, %c0_13] : memref<8x128xf32, #tpu.memory_space<vmem>>, vector<8x128xf32>
    %c0_14 = arith.constant 0 : index
    %c0_15 = arith.constant 0 : index
    %16 = vector.load %arg2[%c0_14, %c0_15] : memref<8x128xf32, #tpu.memory_space<vmem>>, vector<8x128xf32>
    %17 = vector.extract_strided_slice %13 {offsets = [0, 0, 0], sizes = [1, 8, 128], strides = [1, 1, 1]} : vector<8x8x128xf32> to vector<1x8x128xf32>
    %18 = vector.shape_cast %17 : vector<1x8x128xf32> to vector<8x128xf32>
    %19 = arith.truncf %15 : vector<8x128xf32> to vector<8x128xbf16>
    %cst_16 = arith.constant dense<0.000000e+00> : vector<8x128xf32>
    %20 = tpu.matmul %19, %14, %cst_16 {dimension_numbers = #tpu.dot_dimension_numbers<[1], [0], [0], [1], [0, 0, 1, 1], [], []>} : vector<8x128xbf16>, vector<128x128xbf16>, vector<8x128xf32> -> vector<8x128xf32>
    %21 = arith.addf %18, %20 : vector<8x128xf32>
    %22 = arith.negf %21 : vector<8x128xf32>
    %23 = math.exp %22 : vector<8x128xf32>
    %cst_17 = arith.constant 1.000000e+00 : f32
    %24 = vector.broadcast %cst_17 : f32 to vector<8x128xf32>
    %25 = arith.addf %24, %23 : vector<8x128xf32>
    %26 = arith.divf %24, %25 : vector<8x128xf32>
    %c96_i32 = arith.constant 96 : i32
    %27 = tpu.dynamic_rotate %26 by %c96_i32 dim 1 : vector<8x128xf32>, i32 -> vector<8x128xf32>
    %c64_i32 = arith.constant 64 : i32
    %28 = tpu.dynamic_rotate %26 by %c64_i32 dim 1 : vector<8x128xf32>, i32 -> vector<8x128xf32>
    %cst_18 = arith.constant 2.000000e+00 : f32
    %29 = vector.broadcast %cst_18 : f32 to vector<8x128xf32>
    %30 = arith.mulf %29, %28 : vector<8x128xf32>
    %cst_19 = arith.constant 1.000000e+00 : f32
    %31 = vector.broadcast %cst_19 : f32 to vector<8x128xf32>
    %32 = arith.subf %30, %31 : vector<8x128xf32>
    %c32_i32 = arith.constant 32 : i32
    %33 = tpu.dynamic_rotate %26 by %c32_i32 dim 1 : vector<8x128xf32>, i32 -> vector<8x128xf32>
    %34 = arith.mulf %27, %16 : vector<8x128xf32>
    %35 = arith.mulf %26, %32 : vector<8x128xf32>
    %36 = arith.addf %34, %35 : vector<8x128xf32>
    %37 = math.tanh %36 : vector<8x128xf32>
    %38 = arith.mulf %33, %37 : vector<8x128xf32>
    %39 = vector.extract_strided_slice %13 {offsets = [1, 0, 0], sizes = [1, 8, 128], strides = [1, 1, 1]} : vector<8x8x128xf32> to vector<1x8x128xf32>
    %40 = vector.shape_cast %39 : vector<1x8x128xf32> to vector<8x128xf32>
    %41 = arith.truncf %38 : vector<8x128xf32> to vector<8x128xbf16>
    %cst_20 = arith.constant dense<0.000000e+00> : vector<8x128xf32>
    %42 = tpu.matmul %41, %14, %cst_20 {dimension_numbers = #tpu.dot_dimension_numbers<[1], [0], [0], [1], [0, 0, 1, 1], [], []>} : vector<8x128xbf16>, vector<128x128xbf16>, vector<8x128xf32> -> vector<8x128xf32>
    %43 = arith.addf %40, %42 : vector<8x128xf32>
    %44 = arith.negf %43 : vector<8x128xf32>
    %45 = math.exp %44 : vector<8x128xf32>
    %cst_21 = arith.constant 1.000000e+00 : f32
    %46 = vector.broadcast %cst_21 : f32 to vector<8x128xf32>
    %47 = arith.addf %46, %45 : vector<8x128xf32>
    %48 = arith.divf %46, %47 : vector<8x128xf32>
    %c96_i32_22 = arith.constant 96 : i32
    %49 = tpu.dynamic_rotate %48 by %c96_i32_22 dim 1 : vector<8x128xf32>, i32 -> vector<8x128xf32>
    %c64_i32_23 = arith.constant 64 : i32
    %50 = tpu.dynamic_rotate %48 by %c64_i32_23 dim 1 : vector<8x128xf32>, i32 -> vector<8x128xf32>
    %cst_24 = arith.constant 2.000000e+00 : f32
    %51 = vector.broadcast %cst_24 : f32 to vector<8x128xf32>
    %52 = arith.mulf %51, %50 : vector<8x128xf32>
    %cst_25 = arith.constant 1.000000e+00 : f32
    %53 = vector.broadcast %cst_25 : f32 to vector<8x128xf32>
    %54 = arith.subf %52, %53 : vector<8x128xf32>
    %c32_i32_26 = arith.constant 32 : i32
    %55 = tpu.dynamic_rotate %48 by %c32_i32_26 dim 1 : vector<8x128xf32>, i32 -> vector<8x128xf32>
    %56 = arith.mulf %49, %36 : vector<8x128xf32>
    %57 = arith.mulf %48, %54 : vector<8x128xf32>
    %58 = arith.addf %56, %57 : vector<8x128xf32>
    %59 = math.tanh %58 : vector<8x128xf32>
    %60 = arith.mulf %55, %59 : vector<8x128xf32>
    %61 = vector.extract_strided_slice %13 {offsets = [2, 0, 0], sizes = [1, 8, 128], strides = [1, 1, 1]} : vector<8x8x128xf32> to vector<1x8x128xf32>
    %62 = vector.shape_cast %61 : vector<1x8x128xf32> to vector<8x128xf32>
    %63 = arith.truncf %60 : vector<8x128xf32> to vector<8x128xbf16>
    %cst_27 = arith.constant dense<0.000000e+00> : vector<8x128xf32>
    %64 = tpu.matmul %63, %14, %cst_27 {dimension_numbers = #tpu.dot_dimension_numbers<[1], [0], [0], [1], [0, 0, 1, 1], [], []>} : vector<8x128xbf16>, vector<128x128xbf16>, vector<8x128xf32> -> vector<8x128xf32>
    %65 = arith.addf %62, %64 : vector<8x128xf32>
    %66 = arith.negf %65 : vector<8x128xf32>
    %67 = math.exp %66 : vector<8x128xf32>
    %cst_28 = arith.constant 1.000000e+00 : f32
    %68 = vector.broadcast %cst_28 : f32 to vector<8x128xf32>
    %69 = arith.addf %68, %67 : vector<8x128xf32>
    %70 = arith.divf %68, %69 : vector<8x128xf32>
    %c96_i32_29 = arith.constant 96 : i32
    %71 = tpu.dynamic_rotate %70 by %c96_i32_29 dim 1 : vector<8x128xf32>, i32 -> vector<8x128xf32>
    %c64_i32_30 = arith.constant 64 : i32
    %72 = tpu.dynamic_rotate %70 by %c64_i32_30 dim 1 : vector<8x128xf32>, i32 -> vector<8x128xf32>
    %cst_31 = arith.constant 2.000000e+00 : f32
    %73 = vector.broadcast %cst_31 : f32 to vector<8x128xf32>
    %74 = arith.mulf %73, %72 : vector<8x128xf32>
    %cst_32 = arith.constant 1.000000e+00 : f32
    %75 = vector.broadcast %cst_32 : f32 to vector<8x128xf32>
    %76 = arith.subf %74, %75 : vector<8x128xf32>
    %c32_i32_33 = arith.constant 32 : i32
    %77 = tpu.dynamic_rotate %70 by %c32_i32_33 dim 1 : vector<8x128xf32>, i32 -> vector<8x128xf32>
    %78 = arith.mulf %71, %58 : vector<8x128xf32>
    %79 = arith.mulf %70, %76 : vector<8x128xf32>
    %80 = arith.addf %78, %79 : vector<8x128xf32>
    %81 = math.tanh %80 : vector<8x128xf32>
    %82 = arith.mulf %77, %81 : vector<8x128xf32>
    %83 = vector.extract_strided_slice %13 {offsets = [3, 0, 0], sizes = [1, 8, 128], strides = [1, 1, 1]} : vector<8x8x128xf32> to vector<1x8x128xf32>
    %84 = vector.shape_cast %83 : vector<1x8x128xf32> to vector<8x128xf32>
    %85 = arith.truncf %82 : vector<8x128xf32> to vector<8x128xbf16>
    %cst_34 = arith.constant dense<0.000000e+00> : vector<8x128xf32>
    %86 = tpu.matmul %85, %14, %cst_34 {dimension_numbers = #tpu.dot_dimension_numbers<[1], [0], [0], [1], [0, 0, 1, 1], [], []>} : vector<8x128xbf16>, vector<128x128xbf16>, vector<8x128xf32> -> vector<8x128xf32>
    %87 = arith.addf %84, %86 : vector<8x128xf32>
    %88 = arith.negf %87 : vector<8x128xf32>
    %89 = math.exp %88 : vector<8x128xf32>
    %cst_35 = arith.constant 1.000000e+00 : f32
    %90 = vector.broadcast %cst_35 : f32 to vector<8x128xf32>
    %91 = arith.addf %90, %89 : vector<8x128xf32>
    %92 = arith.divf %90, %91 : vector<8x128xf32>
    %c96_i32_36 = arith.constant 96 : i32
    %93 = tpu.dynamic_rotate %92 by %c96_i32_36 dim 1 : vector<8x128xf32>, i32 -> vector<8x128xf32>
    %c64_i32_37 = arith.constant 64 : i32
    %94 = tpu.dynamic_rotate %92 by %c64_i32_37 dim 1 : vector<8x128xf32>, i32 -> vector<8x128xf32>
    %cst_38 = arith.constant 2.000000e+00 : f32
    %95 = vector.broadcast %cst_38 : f32 to vector<8x128xf32>
    %96 = arith.mulf %95, %94 : vector<8x128xf32>
    %cst_39 = arith.constant 1.000000e+00 : f32
    %97 = vector.broadcast %cst_39 : f32 to vector<8x128xf32>
    %98 = arith.subf %96, %97 : vector<8x128xf32>
    %c32_i32_40 = arith.constant 32 : i32
    %99 = tpu.dynamic_rotate %92 by %c32_i32_40 dim 1 : vector<8x128xf32>, i32 -> vector<8x128xf32>
    %100 = arith.mulf %93, %80 : vector<8x128xf32>
    %101 = arith.mulf %92, %98 : vector<8x128xf32>
    %102 = arith.addf %100, %101 : vector<8x128xf32>
    %103 = math.tanh %102 : vector<8x128xf32>
    %104 = arith.mulf %99, %103 : vector<8x128xf32>
    %105 = vector.extract_strided_slice %13 {offsets = [4, 0, 0], sizes = [1, 8, 128], strides = [1, 1, 1]} : vector<8x8x128xf32> to vector<1x8x128xf32>
    %106 = vector.shape_cast %105 : vector<1x8x128xf32> to vector<8x128xf32>
    %107 = arith.truncf %104 : vector<8x128xf32> to vector<8x128xbf16>
    %cst_41 = arith.constant dense<0.000000e+00> : vector<8x128xf32>
    %108 = tpu.matmul %107, %14, %cst_41 {dimension_numbers = #tpu.dot_dimension_numbers<[1], [0], [0], [1], [0, 0, 1, 1], [], []>} : vector<8x128xbf16>, vector<128x128xbf16>, vector<8x128xf32> -> vector<8x128xf32>
    %109 = arith.addf %106, %108 : vector<8x128xf32>
    %110 = arith.negf %109 : vector<8x128xf32>
    %111 = math.exp %110 : vector<8x128xf32>
    %cst_42 = arith.constant 1.000000e+00 : f32
    %112 = vector.broadcast %cst_42 : f32 to vector<8x128xf32>
    %113 = arith.addf %112, %111 : vector<8x128xf32>
    %114 = arith.divf %112, %113 : vector<8x128xf32>
    %c96_i32_43 = arith.constant 96 : i32
    %115 = tpu.dynamic_rotate %114 by %c96_i32_43 dim 1 : vector<8x128xf32>, i32 -> vector<8x128xf32>
    %c64_i32_44 = arith.constant 64 : i32
    %116 = tpu.dynamic_rotate %114 by %c64_i32_44 dim 1 : vector<8x128xf32>, i32 -> vector<8x128xf32>
    %cst_45 = arith.constant 2.000000e+00 : f32
    %117 = vector.broadcast %cst_45 : f32 to vector<8x128xf32>
    %118 = arith.mulf %117, %116 : vector<8x128xf32>
    %cst_46 = arith.constant 1.000000e+00 : f32
    %119 = vector.broadcast %cst_46 : f32 to vector<8x128xf32>
    %120 = arith.subf %118, %119 : vector<8x128xf32>
    %c32_i32_47 = arith.constant 32 : i32
    %121 = tpu.dynamic_rotate %114 by %c32_i32_47 dim 1 : vector<8x128xf32>, i32 -> vector<8x128xf32>
    %122 = arith.mulf %115, %102 : vector<8x128xf32>
    %123 = arith.mulf %114, %120 : vector<8x128xf32>
    %124 = arith.addf %122, %123 : vector<8x128xf32>
    %125 = math.tanh %124 : vector<8x128xf32>
    %126 = arith.mulf %121, %125 : vector<8x128xf32>
    %127 = vector.extract_strided_slice %13 {offsets = [5, 0, 0], sizes = [1, 8, 128], strides = [1, 1, 1]} : vector<8x8x128xf32> to vector<1x8x128xf32>
    %128 = vector.shape_cast %127 : vector<1x8x128xf32> to vector<8x128xf32>
    %129 = arith.truncf %126 : vector<8x128xf32> to vector<8x128xbf16>
    %cst_48 = arith.constant dense<0.000000e+00> : vector<8x128xf32>
    %130 = tpu.matmul %129, %14, %cst_48 {dimension_numbers = #tpu.dot_dimension_numbers<[1], [0], [0], [1], [0, 0, 1, 1], [], []>} : vector<8x128xbf16>, vector<128x128xbf16>, vector<8x128xf32> -> vector<8x128xf32>
    %131 = arith.addf %128, %130 : vector<8x128xf32>
    %132 = arith.negf %131 : vector<8x128xf32>
    %133 = math.exp %132 : vector<8x128xf32>
    %cst_49 = arith.constant 1.000000e+00 : f32
    %134 = vector.broadcast %cst_49 : f32 to vector<8x128xf32>
    %135 = arith.addf %134, %133 : vector<8x128xf32>
    %136 = arith.divf %134, %135 : vector<8x128xf32>
    %c96_i32_50 = arith.constant 96 : i32
    %137 = tpu.dynamic_rotate %136 by %c96_i32_50 dim 1 : vector<8x128xf32>, i32 -> vector<8x128xf32>
    %c64_i32_51 = arith.constant 64 : i32
    %138 = tpu.dynamic_rotate %136 by %c64_i32_51 dim 1 : vector<8x128xf32>, i32 -> vector<8x128xf32>
    %cst_52 = arith.constant 2.000000e+00 : f32
    %139 = vector.broadcast %cst_52 : f32 to vector<8x128xf32>
    %140 = arith.mulf %139, %138 : vector<8x128xf32>
    %cst_53 = arith.constant 1.000000e+00 : f32
    %141 = vector.broadcast %cst_53 : f32 to vector<8x128xf32>
    %142 = arith.subf %140, %141 : vector<8x128xf32>
    %c32_i32_54 = arith.constant 32 : i32
    %143 = tpu.dynamic_rotate %136 by %c32_i32_54 dim 1 : vector<8x128xf32>, i32 -> vector<8x128xf32>
    %144 = arith.mulf %137, %124 : vector<8x128xf32>
    %145 = arith.mulf %136, %142 : vector<8x128xf32>
    %146 = arith.addf %144, %145 : vector<8x128xf32>
    %147 = math.tanh %146 : vector<8x128xf32>
    %148 = arith.mulf %143, %147 : vector<8x128xf32>
    %149 = vector.extract_strided_slice %13 {offsets = [6, 0, 0], sizes = [1, 8, 128], strides = [1, 1, 1]} : vector<8x8x128xf32> to vector<1x8x128xf32>
    %150 = vector.shape_cast %149 : vector<1x8x128xf32> to vector<8x128xf32>
    %151 = arith.truncf %148 : vector<8x128xf32> to vector<8x128xbf16>
    %cst_55 = arith.constant dense<0.000000e+00> : vector<8x128xf32>
    %152 = tpu.matmul %151, %14, %cst_55 {dimension_numbers = #tpu.dot_dimension_numbers<[1], [0], [0], [1], [0, 0, 1, 1], [], []>} : vector<8x128xbf16>, vector<128x128xbf16>, vector<8x128xf32> -> vector<8x128xf32>
    %153 = arith.addf %150, %152 : vector<8x128xf32>
    %154 = arith.negf %153 : vector<8x128xf32>
    %155 = math.exp %154 : vector<8x128xf32>
    %cst_56 = arith.constant 1.000000e+00 : f32
    %156 = vector.broadcast %cst_56 : f32 to vector<8x128xf32>
    %157 = arith.addf %156, %155 : vector<8x128xf32>
    %158 = arith.divf %156, %157 : vector<8x128xf32>
    %c96_i32_57 = arith.constant 96 : i32
    %159 = tpu.dynamic_rotate %158 by %c96_i32_57 dim 1 : vector<8x128xf32>, i32 -> vector<8x128xf32>
    %c64_i32_58 = arith.constant 64 : i32
    %160 = tpu.dynamic_rotate %158 by %c64_i32_58 dim 1 : vector<8x128xf32>, i32 -> vector<8x128xf32>
    %cst_59 = arith.constant 2.000000e+00 : f32
    %161 = vector.broadcast %cst_59 : f32 to vector<8x128xf32>
    %162 = arith.mulf %161, %160 : vector<8x128xf32>
    %cst_60 = arith.constant 1.000000e+00 : f32
    %163 = vector.broadcast %cst_60 : f32 to vector<8x128xf32>
    %164 = arith.subf %162, %163 : vector<8x128xf32>
    %c32_i32_61 = arith.constant 32 : i32
    %165 = tpu.dynamic_rotate %158 by %c32_i32_61 dim 1 : vector<8x128xf32>, i32 -> vector<8x128xf32>
    %166 = arith.mulf %159, %146 : vector<8x128xf32>
    %167 = arith.mulf %158, %164 : vector<8x128xf32>
    %168 = arith.addf %166, %167 : vector<8x128xf32>
    %169 = math.tanh %168 : vector<8x128xf32>
    %170 = arith.mulf %165, %169 : vector<8x128xf32>
    %171 = vector.extract_strided_slice %13 {offsets = [7, 0, 0], sizes = [1, 8, 128], strides = [1, 1, 1]} : vector<8x8x128xf32> to vector<1x8x128xf32>
    %172 = vector.shape_cast %171 : vector<1x8x128xf32> to vector<8x128xf32>
    %173 = arith.truncf %170 : vector<8x128xf32> to vector<8x128xbf16>
    %cst_62 = arith.constant dense<0.000000e+00> : vector<8x128xf32>
    %174 = tpu.matmul %173, %14, %cst_62 {dimension_numbers = #tpu.dot_dimension_numbers<[1], [0], [0], [1], [0, 0, 1, 1], [], []>} : vector<8x128xbf16>, vector<128x128xbf16>, vector<8x128xf32> -> vector<8x128xf32>
    %175 = arith.addf %172, %174 : vector<8x128xf32>
    %176 = arith.negf %175 : vector<8x128xf32>
    %177 = math.exp %176 : vector<8x128xf32>
    %cst_63 = arith.constant 1.000000e+00 : f32
    %178 = vector.broadcast %cst_63 : f32 to vector<8x128xf32>
    %179 = arith.addf %178, %177 : vector<8x128xf32>
    %180 = arith.divf %178, %179 : vector<8x128xf32>
    %c96_i32_64 = arith.constant 96 : i32
    %181 = tpu.dynamic_rotate %180 by %c96_i32_64 dim 1 : vector<8x128xf32>, i32 -> vector<8x128xf32>
    %c64_i32_65 = arith.constant 64 : i32
    %182 = tpu.dynamic_rotate %180 by %c64_i32_65 dim 1 : vector<8x128xf32>, i32 -> vector<8x128xf32>
    %cst_66 = arith.constant 2.000000e+00 : f32
    %183 = vector.broadcast %cst_66 : f32 to vector<8x128xf32>
    %184 = arith.mulf %183, %182 : vector<8x128xf32>
    %cst_67 = arith.constant 1.000000e+00 : f32
    %185 = vector.broadcast %cst_67 : f32 to vector<8x128xf32>
    %186 = arith.subf %184, %185 : vector<8x128xf32>
    %c32_i32_68 = arith.constant 32 : i32
    %187 = tpu.dynamic_rotate %180 by %c32_i32_68 dim 1 : vector<8x128xf32>, i32 -> vector<8x128xf32>
    %188 = arith.mulf %181, %168 : vector<8x128xf32>
    %189 = arith.mulf %180, %186 : vector<8x128xf32>
    %190 = arith.addf %188, %189 : vector<8x128xf32>
    %191 = math.tanh %190 : vector<8x128xf32>
    %192 = arith.mulf %187, %191 : vector<8x128xf32>
    %193 = vector.extract_strided_slice %192 {offsets = [0, 0], sizes = [2, 128], strides = [1, 1]} : vector<8x128xf32> to vector<2x128xf32>
    %c0_69 = arith.constant 0 : index
    %c0_70 = arith.constant 0 : index
    %194 = vector.load %arg8[%c0_69, %c0_70] : memref<128x32xf32, #tpu.memory_space<vmem>>, vector<128x32xf32>
    %cst_71 = arith.constant dense<0.000000e+00> : vector<2x32xf32>
    %195 = tpu.matmul %193, %194, %cst_71 {dimension_numbers = #tpu.dot_dimension_numbers<[1], [0], [0], [1], [0, 0, 1, 1], [], []>} : vector<2x128xf32>, vector<128x32xf32>, vector<2x32xf32> -> vector<2x32xf32>
    %196 = vector.extract_strided_slice %192 {offsets = [2, 0], sizes = [2, 128], strides = [1, 1]} : vector<8x128xf32> to vector<2x128xf32>
    %c0_72 = arith.constant 0 : index
    %c0_73 = arith.constant 0 : index
    %197 = vector.load %arg9[%c0_72, %c0_73] : memref<128x32xf32, #tpu.memory_space<vmem>>, vector<128x32xf32>
    %cst_74 = arith.constant dense<0.000000e+00> : vector<2x32xf32>
    %198 = tpu.matmul %196, %197, %cst_74 {dimension_numbers = #tpu.dot_dimension_numbers<[1], [0], [0], [1], [0, 0, 1, 1], [], []>} : vector<2x128xf32>, vector<128x32xf32>, vector<2x32xf32> -> vector<2x32xf32>
    %199 = arith.addf %195, %198 : vector<2x32xf32>
    %c0_75 = arith.constant 0 : index
    %c0_76 = arith.constant 0 : index
    %200 = vector.load %arg10[%c0_75, %c0_76] : memref<1x32xf32, #tpu.memory_space<vmem>>, vector<1x32xf32>
    %201 = vector.broadcast %200 : vector<1x32xf32> to vector<2x32xf32>
    %202 = arith.addf %199, %201 : vector<2x32xf32>
    %cst_77 = arith.constant 0.000000e+00 : f32
    %203 = vector.broadcast %cst_77 : f32 to vector<2x32xf32>
    %204 = arith.maximumf %202, %203 : vector<2x32xf32>
    %c0_78 = arith.constant 0 : index
    %c0_79 = arith.constant 0 : index
    %205 = vector.load %arg11[%c0_78, %c0_79] : memref<32x3xf32, #tpu.memory_space<vmem>>, vector<32x3xf32>
    %cst_80 = arith.constant dense<0.000000e+00> : vector<2x3xf32>
    %206 = tpu.matmul %204, %205, %cst_80 {dimension_numbers = #tpu.dot_dimension_numbers<[1], [0], [0], [1], [0, 0, 1, 1], [], []>} : vector<2x32xf32>, vector<32x3xf32>, vector<2x3xf32> -> vector<2x3xf32>
    %c0_81 = arith.constant 0 : index
    %c0_82 = arith.constant 0 : index
    %207 = vector.load %arg12[%c0_81, %c0_82] : memref<1x3xf32, #tpu.memory_space<vmem>>, vector<1x3xf32>
    %208 = vector.broadcast %207 : vector<1x3xf32> to vector<2x3xf32>
    %209 = arith.addf %206, %208 : vector<2x3xf32>
    %cst_83 = arith.constant dense<0xFF800000> : vector<2xf32>
    %210 = vector.multi_reduction <maximumf>, %209, %cst_83 [1] : vector<2x3xf32> to vector<2xf32>
    %211 = vector.shape_cast %210 : vector<2xf32> to vector<2x1xf32>
    %212 = vector.broadcast %211 : vector<2x1xf32> to vector<2x3xf32>
    %213 = arith.subf %209, %212 : vector<2x3xf32>
    %214 = math.exp %213 : vector<2x3xf32>
    %cst_84 = arith.constant dense<0.000000e+00> : vector<2xf32>
    %215 = vector.multi_reduction <add>, %214, %cst_84 [1] : vector<2x3xf32> to vector<2xf32>
    %216 = vector.shape_cast %215 : vector<2xf32> to vector<2x1xf32>
    %217 = vector.broadcast %216 : vector<2x1xf32> to vector<2x3xf32>
    %218 = arith.divf %214, %217 : vector<2x3xf32>
    %c0_85 = arith.constant 0 : index
    %c0_86 = arith.constant 0 : index
    %219 = vector.load %arg13[%c0_85, %c0_86] : memref<2x3xf32, #tpu.memory_space<vmem>>, vector<2x3xf32>
    tpu.vector_store %arg13[%c0_85, %c0_86], %218 {strides = array<i32>} : memref<2x3xf32, #tpu.memory_space<vmem>>, vector<2x3xf32>,
    return
  }
}

</mosaic_0001>

<bundles_post_ra>
// kernel: rnn_prediction_net.1
= control target key start
LH: loop header
LB: loop body
LE: loop exit
PB: predicated region body
PF: predicated region fallthrough
CT: control target
= control target key end

     0   :  { %vm95_vm0 = vcmask 1043456   ;;  %vm82_vm1 = vcmask 64512   ;;  %v1665_v4 = vmov 0.0   ;;  %s2185_s0 = inlined_call_operand.vmem [shape: bf16[64,8], index: 0, kind: input, shape index: {}]   ;;  %s2186_s1 = inlined_call_operand.vmem [shape: f32[8,128], index: 1, kind: input, shape index: {}]   ;;  %s2187_s2 = inlined_call_operand.vmem [shape: f32[8,128], index: 2, kind: input, shape index: {}]   ;;  %s2188_s3 = inlined_call_operand.vmem [shape: bf16[8,32], index: 3, kind: input, shape index: {}]   ;;  %s2189_s4 = inlined_call_operand.vmem [shape: f32[1,32], index: 4, kind: input, shape index: {}]   ;;  %s2190_s5 = inlined_call_operand.vmem [shape: bf16[32,128], index: 5, kind: input, shape index: {}]   ;;  %s2191_s6 = inlined_call_operand.vmem [shape: f32[1,128], index: 6, kind: input, shape index: {}]   ;;  %s2192_s7 = inlined_call_operand.vmem [shape: bf16[128,128], index: 7, kind: input, shape index: {}]   ;;  %s2193_s8 = inlined_call_operand.vmem [shape: f32[128,32], index: 8, kind: input, shape index: {}]   ;;  %s2194_s9 = inlined_call_operand.vmem [shape: f32[128,32], index: 9, kind: input, shape index: {}]   ;;  %s2195_s10 = inlined_call_operand.vmem [shape: f32[1,32], index: 10, kind: input, shape index: {}]   ;;  %s2196_s11 = inlined_call_operand.vmem [shape: f32[32,3], index: 11, kind: input, shape index: {}]   ;;  %s2197_s12 = inlined_call_operand.vmem [shape: f32[1,3], index: 12, kind: input, shape index: {}]   ;;  %s2198_s13 = inlined_call_operand.hbm [shape: f32[2,3], index: 13, kind: output, shape index: {}]  }
   0x1   :  { %v54_v0 = vld [vmem:[%s2188_s3] sm:$0xf]  ;;  %v1562_v3 = vld [vmem:[%s2185_s0 + $0x8] sm:$0xff]   ;;  %v1755_v5 = vld [vmem:[%s2192_s7 + $0x38] sm:$0xff]  }
   0x2   :  { %v1561_v1 = vld [vmem:[%s2185_s0] sm:$0xff]   ;;  %1554 = vmatprep.subr.msk.bf16.mxu0 %vm95_vm0, %v54_v0  ;;  %v97_v2 = vsel %vm95_vm0, %v54_v0, 0  ;;  %v1760_v6 = vld [vmem:[%s2192_s7 + $0x30] sm:$0xff]  }
   0x3   :  { %1292 = vmatpush3.bf16.msra.mxu0 %v97_v2  ;;  %1293 = vmatprep.mubr.msk.bf16.mxu0 %vm82_vm1, %v1561_v1 }
   0x4   :  { %1313 = vmatprep.subr.bf16.mxu0 %v1665_v4 }
   0x6   :  { %1294 = vmatmul.mubr.msk.bf16.vlgmr.msra.gmra.mxu0 %vm82_vm1, %v1562_v3 }
   0x7   :  { %1314 = vmatpush3.bf16.msra.mxu0 %v1755_v5 }
   0x8   :  { %1315 = vmatprep.subr.bf16.mxu0 %v1665_v4 }
   0xb   :  { %1316 = vmatpush3.bf16.msra.mxu0 %v1760_v6 }
   0xc   :  { %1317 = vmatprep.subr.bf16.mxu0 %v1665_v4 }
   0xd   :  { %18 = vsyncpa [#allocation3], 0  ;;  %v1770_v7 = vld [vmem:[%s2192_s7 + $0x28] sm:$0xff]   ;;  %v1777_v8 = vld [vmem:[%s2192_s7 + $0x20] sm:$0xff]   ;;  %vm1666_vm2 = vmmov 0   ;;  %vm199_vm3 = vcmask 261120  }
   0xe   :  { %v1567_v9 = vld [vmem:[%s2185_s0 + $0x10] sm:$0xff]   ;;  %v1568_v10 = vld [vmem:[%s2185_s0 + $0x18] sm:$0xff]   ;;  %v1572_v12 = vld [vmem:[%s2190_s5 + $0x8] sm:$0xff]   ;;  %s1667_s20 = smov 32   ;;  %s1668_s21 = smov 64   ;;  %vm1099_vm4 = vcmask 17408  }
   0xf   :  { %1318 = vmatpush3.bf16.msra.mxu0 %v1770_v7  ;;  %v1790_v11 = vld [vmem:[%s2192_s7 + $0x18] sm:$0xff]   ;;  %1297 = vmatprep.mubr.msk.bf16.mxu0 %vm82_vm1, %v1567_v9  ;;  %v1801_v13 = vld [vmem:[%s2192_s7 + $0x10] sm:$0xff]   ;;  %v1574_v14 = vld [vmem:[%s2190_s5] sm:$0xff]   ;;  %s1669_s22 = smov 96  }
  0x10   :  { %1319 = vmatprep.subr.bf16.mxu0 %v1665_v4  ;;  %1298 = vmatmul.mubr.msk.bf16.gmra.mxu0 %vm82_vm1, %v1568_v10  ;;  %v1813_v15 = vld [vmem:[%s2192_s7 + $0x8] sm:$0xff]   ;;  %v1821_v16 = vld [vmem:[%s2192_s7] sm:$0xff]  }
  0x11   :  { %1329 = vmatprep.mubr.msk.bf16.mxu0 %vm1666_vm2, %v1665_v4  ;;  %1301 = vmatprep.subr.bf16.mxu1 %v1572_v12  ;;  %v293_v17 = vld [vmem:[%s2186_s1] sm:$0xff] }
  0x12   :  { %1302 = vmatpush3.bf16.msra.mxu1 %v1572_v12  ;;  %v295_v18 = vpack.c.bf16 %v293_v17, %v293_v17  ;;  %v1126_v20 = vld [vmem:[%s2189_s4] ss:$0 sm:$0xff] }
  0x13   :  { %1320 = vmatpush3.bf16.msra.mxu0 %v1777_v8  ;;  %1303 = vmatprep.subr.bf16.mxu1 %v1574_v14  ;;  %v1877_v53 = vld [vmem:[%s2191_s6] ss:$0 sm:$0xff] }
  0x14   :  { %1321 = vmatprep.subr.bf16.mxu0 %v1665_v4  ;;  %v294_v63 = vld [vmem:[%s2187_s2] sm:$0xff] }
  0x16   :  { %1304 = vmatpush3.bf16.msra.mxu1 %v1574_v14 }
  0x17   :  { %1322 = vmatpush3.bf16.msra.mxu0 %v1790_v11  ;;  %1333 = vmatprep.subr.bf16.mxu1 %v1665_v4 }
  0x18   :  { %1323 = vmatprep.subr.bf16.mxu0 %v1665_v4 }
  0x1b   :  { %1324 = vmatpush3.bf16.msra.mxu0 %v1801_v13 }
  0x1c   :  { %1325 = vmatprep.subr.bf16.mxu0 %v1665_v4 }
  0x1f   :  { %1326 = vmatpush3.bf16.msra.mxu0 %v1813_v15 }
  0x20   :  { %1327 = vmatprep.subr.bf16.mxu0 %v1665_v4 }
  0x23   :  { %1328 = vmatpush3.bf16.msra.mxu0 %v1821_v16 }
  0x24   :  { %1353 = vmatprep.subr.bf16.mxu0 %v1665_v4 }
  0x26   :  { %1330 = vmatmul.mubr.bf16.vlgmr.msra.gmra.mxu0 %v295_v18 }
  0x27   :  { %1354 = vmatpush3.bf16.msra.mxu0 %v1755_v5  ;;  %1369 = vmatprep.mubr.msk.bf16.mxu0 %vm1666_vm2, %v1665_v4 }
  0x28   :  { %1355 = vmatprep.subr.bf16.mxu0 %v1665_v4 }
  0x2b   :  { %1356 = vmatpush3.bf16.msra.mxu0 %v1760_v6 }
  0x2c   :  { %1357 = vmatprep.subr.bf16.mxu0 %v1665_v4 }
  0x2f   :  { %1358 = vmatpush3.bf16.msra.mxu0 %v1770_v7 }
  0x30   :  { %1359 = vmatprep.subr.bf16.mxu0 %v1665_v4 }
  0x33   :  { %1360 = vmatpush3.bf16.msra.mxu0 %v1777_v8 }
  0x34   :  { %1361 = vmatprep.subr.bf16.mxu0 %v1665_v4 }
  0x37   :  { %1362 = vmatpush3.bf16.msra.mxu0 %v1790_v11 }
  0x38   :  { %1363 = vmatprep.subr.bf16.mxu0 %v1665_v4 }
  0x3b   :  { %1364 = vmatpush3.bf16.msra.mxu0 %v1801_v13 }
  0x3c   :  { %1365 = vmatprep.subr.bf16.mxu0 %v1665_v4 }
  0x3f   :  { %1366 = vmatpush3.bf16.msra.mxu0 %v1813_v15 }
  0x40   :  { %1367 = vmatprep.subr.bf16.mxu0 %v1665_v4 }
  0x43   :  { %1368 = vmatpush3.bf16.msra.mxu0 %v1821_v16 }
  0x44   :  { %1393 = vmatprep.subr.bf16.mxu0 %v1665_v4 }
  0xc6   :  { %v1295_v19 = vpop.f32.mrf.mxu0 }
  0xc7   :  { %v142_v25 = vadd.f32 %v1295_v19, %v1126_v20 }
  0xc8   :  { %v133_v21 = vpop.f32.mrf.mxu0 }
  0xc9   :  { %v134_v22 = vadd.f32 %v1126_v20, %v133_v21 }
  0xca   :  { %v1296_v23 = vpop.f32.mrf.mxu0 }
  0xcb   :  { %v145_v24 = vadd.f32 %v1296_v23, %v1126_v20  ;;  %1575 = vtanh.f32 %v134_v22 }
  0xcc   :  { %v136_v26 = vpop.f32.mrf.mxu0 }
  0xcd   :  { %v137_v27 = vadd.f32 %v1126_v20, %v136_v26  ;;  %1577 = vtanh.f32 %v145_v24 }
  0xcf   :  { %1579 = vtanh.f32 %v137_v27 }
  0xd0   :  { %1581 = vtanh.f32 %v142_v25  ;;  %v1299_v34 = vpop.f32.mrf.mxu0 }
  0xd1   :  { %v158_v35 = vadd.f32 %v1299_v34, %v1126_v20 }
  0xd2   :  { %v149_v36 = vpop.f32.mrf.mxu0 }
  0xd3   :  { %v150_v37 = vadd.f32 %v1126_v20, %v149_v36  ;;  %1583 = vtanh.f32 %v158_v35 }
  0xd4   :  { %v1300_v38 = vpop.f32.mrf.mxu0 }
  0xd5   :  { %v161_v39 = vadd.f32 %v1300_v38, %v1126_v20  ;;  %1585 = vtanh.f32 %v150_v37 }
  0xd6   :  { %v152_v40 = vpop.f32.mrf.mxu0 }
  0xd7   :  { %v153_v41 = vadd.f32 %v1126_v20, %v152_v40  ;;  %1587 = vtanh.f32 %v161_v39 }
  0xd8   :  { %v1576_v28 = vpop.eup %1575 }
  0xd9   :  { %1589 = vtanh.f32 %v153_v41 }
  0xda   :  { %v1578_v29 = vpop.eup %1577 }
  0xdc   :  { %v1580_v30 = vpop.eup %1579 }
  0xdd   :  { %v1582_v31 = vpop.eup %1581  ;;  %v172_v32 = vpack.c.bf16 %v1580_v30, %v1576_v28 }
  0xde   :  { %v173_v33 = vpack.c.bf16 %v1578_v29, %v1582_v31 }
  0xdf   :  { %1305 = vmatprep.mubr.msk.bf16.mxu1 %vm199_vm3, %v172_v32 }
  0xe0   :  { %1306 = vmatmul.mubr.msk.bf16.vlgmr.msra.gmra.mxu1 %vm199_vm3, %v173_v33  ;;  %v1584_v44 = vpop.eup %1583 }
  0xe1   :  { %1334 = vmatpush3.bf16.msra.mxu1 %v1755_v5 }
  0xe2   :  { %1335 = vmatprep.subr.bf16.mxu1 %v1665_v4  ;;  %v1586_v45 = vpop.eup %1585 }
  0xe4   :  { %v1588_v47 = vpop.eup %1587 }
  0xe5   :  { %1336 = vmatpush3.bf16.msra.mxu1 %v1760_v6  ;;  %v175_v51 = vpack.c.bf16 %v1588_v47, %v1584_v44 }
  0xe6   :  { %1337 = vmatprep.subr.bf16.mxu1 %v1665_v4  ;;  %v378_v42 = vpop.f32.mrf.mxu0  ;;  %v1590_v48 = vpop.eup %1589 }
  0xe7   :  { %v174_v50 = vpack.c.bf16 %v1590_v48, %v1586_v45 }
  0xe8   :  { %v1331_v43 = vpop.f32.mrf.mxu0 }
  0xe9   :  { %1338 = vmatpush3.bf16.msra.mxu1 %v1770_v7  ;;  %1309 = vmatprep.mubr.msk.bf16.mxu1 %vm199_vm3, %v174_v50 }
  0xea   :  { %1339 = vmatprep.subr.bf16.mxu1 %v1665_v4  ;;  %v381_v46 = vpop.f32.mrf.mxu0  ;;  %1310 = vmatmul.mubr.msk.bf16.gmra.mxu1 %vm199_vm3, %v175_v51 }
  0xeb   :  { %1349 = vmatprep.mubr.msk.bf16.mxu1 %vm1666_vm2, %v1665_v4 }
  0xec   :  { %v1332_v49 = vpop.f32.mrf.mxu0 }
  0xed   :  { %1340 = vmatpush3.bf16.msra.mxu1 %v1777_v8 }
  0xee   :  { %1341 = vmatprep.subr.bf16.mxu1 %v1665_v4 }
  0xf1   :  { %1342 = vmatpush3.bf16.msra.mxu1 %v1790_v11 }
  0xf2   :  { %1343 = vmatprep.subr.bf16.mxu1 %v1665_v4 }
  0xf5   :  { %1344 = vmatpush3.bf16.msra.mxu1 %v1801_v13 }
  0xf6   :  { %1345 = vmatprep.subr.bf16.mxu1 %v1665_v4 }
  0xf9   :  { %1346 = vmatpush3.bf16.msra.mxu1 %v1813_v15 }
  0xfa   :  { %1347 = vmatprep.subr.bf16.mxu1 %v1665_v4 }
  0xfd   :  { %1348 = vmatpush3.bf16.msra.mxu1 %v1821_v16 }
  0xfe   :  { %1373 = vmatprep.subr.bf16.mxu1 %v1665_v4 }
 0x1a0   :  { %v1872_v52 = vpop.f32.mrf.mxu1 }
 0x1a1   :  { %v255_v45 = vadd.f32 %v1872_v52, %v1877_v53 }
 0x1a2   :  { %v246_v54 = vpop.f32.mrf.mxu1 }
 0x1a3   :  { %v247_v55 = vadd.f32 %v1877_v53, %v246_v54 }
 0x1a4   :  { %v1904_v18 = vpop.f32.mrf.mxu1 }
 0x1a5   :  { %v384_v56 = vadd.f32 %v378_v42, %v247_v55 }
 0x1a6   :  { %v249_v19 = vpop.f32.mrf.mxu1 }
 0x1a7   :  { %v1150_v57 = vmul.f32 -1.442695, %v384_v56  ;;  %v250_v24 = vadd.f32 %v1877_v53, %v249_v19 }
 0x1a9   :  { %1591 = vpow2.f32 %v1150_v57 }
 0x1aa   :  { %v1906_v20 = vpop.f32.mrf.mxu1 }
 0x1ac   :  { %v1908_v21 = vpop.f32.mrf.mxu1 }
 0x1ae   :  { %v1910_v22 = vpop.f32.mrf.mxu1 }
 0x1b0   :  { %v1912_v23 = vpop.f32.mrf.mxu1 }
 0x1b6   :  { %v1592_v58 = vpop.eup %1591 }
 0x1b7   :  { %v388_v59 = vadd.f32 1.0, %v1592_v58 }
 0x1b9   :  { %1593 = vrcp.f32 %v388_v59 }
 0x1c6   :  { %v1594_v60 = vpop.eup %1593 }
 0x1c7   :  { %397 = vrot.lane.b32.xlu1 %v1594_v60, %s1667_s20  ;;  %393 = vrot.lane.b32.xlu0 %v1594_v60, %s1668_s21 }
 0x1cb   :  { %391 = vrot.lane.b32.xlu0 %v1594_v60, %s1669_s22 }
 0x239   :  { %v394_v61 = vpop.permute.xlu0 %393  ;;  %v398_v12 = vpop.permute.xlu1 %397 }
 0x23a   :  { %v395_v62 = vmul.f32 2.0, %v394_v61 }
 0x23c   :  { %v1151_v0 = vadd.f32 -1.0, %v395_v62 }
 0x23d   :  { %v392_v1 = vpop.permute.xlu0 %391 }
 0x23e   :  { %v400_v2 = vmul.f32 %v1594_v60, %v1151_v0  ;;  %v399_v3 = vmul.f32 %v392_v1, %v294_v63 }
 0x240   :  { %v401_v9 = vadd.f32 %v400_v2, %v399_v3  ;;  %v258_v3 = vadd.f32 %v1904_v18, %v1877_v53 }
 0x242   :  { %1595 = vtanh.f32 %v401_v9 }
 0x24f   :  { %v1596_v10 = vpop.eup %1595 }
 0x250   :  { %v403_v14 = vmul.f32 %v1596_v10, %v398_v12 }
 0x252   :  { %v404_v17 = vpack.c.bf16 %v403_v14, %v403_v14 }
 0x254   :  { %1350 = vmatmul.mubr.bf16.vlgmr.msra.gmra.mxu1 %v404_v17 }
 0x255   :  { %1374 = vmatpush3.bf16.msra.mxu1 %v1755_v5  ;;  %1389 = vmatprep.mubr.msk.bf16.mxu1 %vm1666_vm2, %v1665_v4 }
 0x256   :  { %1375 = vmatprep.subr.bf16.mxu1 %v1665_v4 }
 0x259   :  { %1376 = vmatpush3.bf16.msra.mxu1 %v1760_v6 }
 0x25a   :  { %1377 = vmatprep.subr.bf16.mxu1 %v1665_v4 }
 0x25d   :  { %1378 = vmatpush3.bf16.msra.mxu1 %v1770_v7 }
 0x25e   :  { %1379 = vmatprep.subr.bf16.mxu1 %v1665_v4 }
 0x261   :  { %1380 = vmatpush3.bf16.msra.mxu1 %v1777_v8 }
 0x262   :  { %1381 = vmatprep.subr.bf16.mxu1 %v1665_v4 }
 0x265   :  { %1382 = vmatpush3.bf16.msra.mxu1 %v1790_v11 }
 0x266   :  { %1383 = vmatprep.subr.bf16.mxu1 %v1665_v4 }
 0x269   :  { %1384 = vmatpush3.bf16.msra.mxu1 %v1801_v13 }
 0x26a   :  { %1385 = vmatprep.subr.bf16.mxu1 %v1665_v4 }
 0x26d   :  { %1386 = vmatpush3.bf16.msra.mxu1 %v1813_v15 }
 0x26e   :  { %1387 = vmatprep.subr.bf16.mxu1 %v1665_v4 }
 0x271   :  { %1388 = vmatpush3.bf16.msra.mxu1 %v1821_v16 }
 0x272   :  { %1413 = vmatprep.subr.bf16.mxu1 %v1665_v4 }
 0x314   :  { %v439_v25 = vpop.f32.mrf.mxu1 }
 0x315   :  { %v445_v26 = vadd.f32 %v439_v25, %v250_v24 }
 0x316   :  { %v1351_v27 = vpop.f32.mrf.mxu1 }
 0x317   :  { %v1152_v28 = vmul.f32 -1.442695, %v445_v26 }
 0x318   :  { %v442_v29 = vpop.f32.mrf.mxu1 }
 0x319   :  { %1597 = vpow2.f32 %v1152_v28 }
 0x31a   :  { %v1352_v30 = vpop.f32.mrf.mxu1 }
 0x326   :  { %v1598_v31 = vpop.eup %1597 }
 0x327   :  { %v449_v32 = vadd.f32 1.0, %v1598_v31 }
 0x329   :  { %1599 = vrcp.f32 %v449_v32 }
 0x336   :  { %v1600_v33 = vpop.eup %1599 }
 0x337   :  { %452 = vrot.lane.b32.xlu0 %v1600_v33, %s1669_s22  ;;  %454 = vrot.lane.b32.xlu1 %v1600_v33, %s1668_s21 }
 0x33b   :  { %458 = vrot.lane.b32.xlu1 %v1600_v33, %s1667_s20 }
 0x3a9   :  { %v455_v34 = vpop.permute.xlu1 %454  ;;  %v453_v36 = vpop.permute.xlu0 %452 }
 0x3aa   :  { %v456_v35 = vmul.f32 2.0, %v455_v34  ;;  %v460_v38 = vmul.f32 %v453_v36, %v401_v9 }
 0x3ac   :  { %v1153_v37 = vadd.f32 -1.0, %v456_v35 }
 0x3ad   :  { %v459_v42 = vpop.permute.xlu1 %458 }
 0x3ae   :  { %v461_v39 = vmul.f32 %v1600_v33, %v1153_v37  ;;  %v263_v37 = vadd.f32 %v1877_v53, %v1908_v21 }
 0x3b0   :  { %v462_v40 = vadd.f32 %v461_v39, %v460_v38 }
 0x3b2   :  { %1601 = vtanh.f32 %v462_v40 }
 0x3bf   :  { %v1602_v41 = vpop.eup %1601 }
 0x3c0   :  { %v464_v43 = vmul.f32 %v1602_v41, %v459_v42 }
 0x3c2   :  { %v465_v44 = vpack.c.bf16 %v464_v43, %v464_v43 }
 0x3c4   :  { %1370 = vmatmul.mubr.bf16.vlgmr.msra.gmra.mxu0 %v465_v44 }
 0x3c5   :  { %1394 = vmatpush3.bf16.msra.mxu0 %v1755_v5  ;;  %1409 = vmatprep.mubr.msk.bf16.mxu0 %vm1666_vm2, %v1665_v4 }
 0x3c6   :  { %1395 = vmatprep.subr.bf16.mxu0 %v1665_v4 }
 0x3c9   :  { %1396 = vmatpush3.bf16.msra.mxu0 %v1760_v6 }
 0x3ca   :  { %1397 = vmatprep.subr.bf16.mxu0 %v1665_v4 }
 0x3cd   :  { %1398 = vmatpush3.bf16.msra.mxu0 %v1770_v7 }
 0x3ce   :  { %1399 = vmatprep.subr.bf16.mxu0 %v1665_v4 }
 0x3d1   :  { %1400 = vmatpush3.bf16.msra.mxu0 %v1777_v8 }
 0x3d2   :  { %1401 = vmatprep.subr.bf16.mxu0 %v1665_v4 }
 0x3d5   :  { %1402 = vmatpush3.bf16.msra.mxu0 %v1790_v11 }
 0x3d6   :  { %1403 = vmatprep.subr.bf16.mxu0 %v1665_v4 }
 0x3d9   :  { %1404 = vmatpush3.bf16.msra.mxu0 %v1801_v13 }
 0x3da   :  { %1405 = vmatprep.subr.bf16.mxu0 %v1665_v4 }
 0x3dd   :  { %1406 = vmatpush3.bf16.msra.mxu0 %v1813_v15 }
 0x3de   :  { %1407 = vmatprep.subr.bf16.mxu0 %v1665_v4 }
 0x3e1   :  { %1408 = vmatpush3.bf16.msra.mxu0 %v1821_v16 }
 0x3e2   :  { %1433 = vmatprep.subr.bf16.mxu0 %v1665_v4 }
 0x484   :  { %v500_v46 = vpop.f32.mrf.mxu0 }
 0x485   :  { %v506_v47 = vadd.f32 %v500_v46, %v255_v45 }
 0x486   :  { %v1371_v48 = vpop.f32.mrf.mxu0 }
 0x487   :  { %v1154_v49 = vmul.f32 -1.442695, %v506_v47 }
 0x488   :  { %v503_v50 = vpop.f32.mrf.mxu0 }
 0x489   :  { %1603 = vpow2.f32 %v1154_v49 }
 0x48a   :  { %v1372_v51 = vpop.f32.mrf.mxu0 }
 0x496   :  { %v1604_v54 = vpop.eup %1603 }
 0x497   :  { %v510_v55 = vadd.f32 1.0, %v1604_v54 }
 0x499   :  { %1605 = vrcp.f32 %v510_v55 }
 0x4a6   :  { %v1606_v56 = vpop.eup %1605 }
 0x4a7   :  { %513 = vrot.lane.b32.xlu1 %v1606_v56, %s1669_s22  ;;  %515 = vrot.lane.b32.xlu0 %v1606_v56, %s1668_s21 }
 0x4ab   :  { %519 = vrot.lane.b32.xlu0 %v1606_v56, %s1667_s20 }
 0x519   :  { %v516_v57 = vpop.permute.xlu0 %515  ;;  %v514_v52 = vpop.permute.xlu1 %513 }
 0x51a   :  { %v517_v58 = vmul.f32 2.0, %v516_v57  ;;  %v521_v60 = vmul.f32 %v514_v52, %v462_v40 }
 0x51c   :  { %v1155_v59 = vadd.f32 -1.0, %v517_v58 }
 0x51d   :  { %v520_v0 = vpop.permute.xlu0 %519 }
 0x51e   :  { %v522_v61 = vmul.f32 %v1606_v56, %v1155_v59 }
 0x520   :  { %v523_v62 = vadd.f32 %v522_v61, %v521_v60 }
 0x522   :  { %1607 = vtanh.f32 %v523_v62 }
 0x52f   :  { %v1608_v63 = vpop.eup %1607 }
 0x530   :  { %v525_v1 = vmul.f32 %v1608_v63, %v520_v0 }
 0x532   :  { %v526_v2 = vpack.c.bf16 %v525_v1, %v525_v1 }
 0x534   :  { %1390 = vmatmul.mubr.bf16.vlgmr.msra.gmra.mxu1 %v526_v2 }
 0x535   :  { %1414 = vmatpush3.bf16.msra.mxu1 %v1755_v5  ;;  %1429 = vmatprep.mubr.msk.bf16.mxu1 %vm1666_vm2, %v1665_v4 }
 0x536   :  { %1415 = vmatprep.subr.bf16.mxu1 %v1665_v4 }
 0x539   :  { %1416 = vmatpush3.bf16.msra.mxu1 %v1760_v6 }
 0x53a   :  { %1417 = vmatprep.subr.bf16.mxu1 %v1665_v4 }
 0x53d   :  { %1418 = vmatpush3.bf16.msra.mxu1 %v1770_v7 }
 0x53e   :  { %1419 = vmatprep.subr.bf16.mxu1 %v1665_v4 }
 0x541   :  { %1420 = vmatpush3.bf16.msra.mxu1 %v1777_v8 }
 0x542   :  { %1421 = vmatprep.subr.bf16.mxu1 %v1665_v4 }
 0x545   :  { %1422 = vmatpush3.bf16.msra.mxu1 %v1790_v11 }
 0x546   :  { %1423 = vmatprep.subr.bf16.mxu1 %v1665_v4 }
 0x549   :  { %1424 = vmatpush3.bf16.msra.mxu1 %v1801_v13 }
 0x54a   :  { %1425 = vmatprep.subr.bf16.mxu1 %v1665_v4 }
 0x54d   :  { %1426 = vmatpush3.bf16.msra.mxu1 %v1813_v15 }
 0x54e   :  { %1427 = vmatprep.subr.bf16.mxu1 %v1665_v4 }
 0x551   :  { %1428 = vmatpush3.bf16.msra.mxu1 %v1821_v16 }
 0x552   :  { %1453 = vmatprep.subr.bf16.mxu1 %v1665_v4 }
 0x5f4   :  { %v561_v9 = vpop.f32.mrf.mxu1 }
 0x5f5   :  { %v567_v10 = vadd.f32 %v561_v9, %v258_v3 }
 0x5f6   :  { %v1391_v12 = vpop.f32.mrf.mxu1 }
 0x5f7   :  { %v1156_v14 = vmul.f32 -1.442695, %v567_v10  ;;  %v271_v12 = vadd.f32 %v1906_v20, %v1877_v53 }
 0x5f8   :  { %v564_v17 = vpop.f32.mrf.mxu1 }
 0x5f9   :  { %1609 = vpow2.f32 %v1156_v14 }
 0x5fa   :  { %v1392_v19 = vpop.f32.mrf.mxu1 }
 0x606   :  { %v1610_v24 = vpop.eup %1609 }
 0x607   :  { %v571_v25 = vadd.f32 1.0, %v1610_v24 }
 0x609   :  { %1611 = vrcp.f32 %v571_v25 }
 0x616   :  { %v1612_v26 = vpop.eup %1611 }
 0x617   :  { %574 = vrot.lane.b32.xlu0 %v1612_v26, %s1669_s22  ;;  %576 = vrot.lane.b32.xlu1 %v1612_v26, %s1668_s21 }
 0x61b   :  { %580 = vrot.lane.b32.xlu1 %v1612_v26, %s1667_s20 }
 0x689   :  { %v577_v27 = vpop.permute.xlu1 %576  ;;  %v575_v18 = vpop.permute.xlu0 %574 }
 0x68a   :  { %v578_v28 = vmul.f32 2.0, %v577_v27  ;;  %v582_v30 = vmul.f32 %v575_v18, %v523_v62 }
 0x68c   :  { %v1157_v29 = vadd.f32 -1.0, %v578_v28 }
 0x68d   :  { %v581_v34 = vpop.permute.xlu1 %580 }
 0x68e   :  { %v583_v31 = vmul.f32 %v1612_v26, %v1157_v29 }
 0x690   :  { %v584_v32 = vadd.f32 %v583_v31, %v582_v30 }
 0x692   :  { %1613 = vtanh.f32 %v584_v32 }
 0x69f   :  { %v1614_v33 = vpop.eup %1613 }
 0x6a0   :  { %v586_v35 = vmul.f32 %v1614_v33, %v581_v34 }
 0x6a2   :  { %v587_v36 = vpack.c.bf16 %v586_v35, %v586_v35 }
 0x6a4   :  { %1410 = vmatmul.mubr.bf16.vlgmr.msra.gmra.mxu0 %v587_v36 }
 0x6a5   :  { %1434 = vmatpush3.bf16.msra.mxu0 %v1755_v5  ;;  %1449 = vmatprep.mubr.msk.bf16.mxu0 %vm1666_vm2, %v1665_v4 }
 0x6a6   :  { %1435 = vmatprep.subr.bf16.mxu0 %v1665_v4 }
 0x6a9   :  { %1436 = vmatpush3.bf16.msra.mxu0 %v1760_v6 }
 0x6aa   :  { %1437 = vmatprep.subr.bf16.mxu0 %v1665_v4 }
 0x6ad   :  { %1438 = vmatpush3.bf16.msra.mxu0 %v1770_v7 }
 0x6ae   :  { %1439 = vmatprep.subr.bf16.mxu0 %v1665_v4 }
 0x6b1   :  { %1440 = vmatpush3.bf16.msra.mxu0 %v1777_v8 }
 0x6b2   :  { %1441 = vmatprep.subr.bf16.mxu0 %v1665_v4 }
 0x6b5   :  { %1442 = vmatpush3.bf16.msra.mxu0 %v1790_v11 }
 0x6b6   :  { %1443 = vmatprep.subr.bf16.mxu0 %v1665_v4 }
 0x6b9   :  { %1444 = vmatpush3.bf16.msra.mxu0 %v1801_v13 }
 0x6ba   :  { %1445 = vmatprep.subr.bf16.mxu0 %v1665_v4 }
 0x6bd   :  { %1446 = vmatpush3.bf16.msra.mxu0 %v1813_v15 }
 0x6be   :  { %1447 = vmatprep.subr.bf16.mxu0 %v1665_v4 }
 0x6c1   :  { %1448 = vmatpush3.bf16.msra.mxu0 %v1821_v16 }
 0x6c2   :  { %1473 = vmatprep.subr.mxu0 %v1665_v4 }
 0x764   :  { %v622_v38 = vpop.f32.mrf.mxu0 }
 0x765   :  { %v628_v39 = vadd.f32 %v622_v38, %v263_v37 }
 0x766   :  { %v1411_v40 = vpop.f32.mrf.mxu0 }
 0x767   :  { %v1158_v41 = vmul.f32 -1.442695, %v628_v39  ;;  %v846_v39 = vld [vmem:[%s2193_s8 + $0x78] sm:$0xff] }
 0x768   :  { %v625_v42 = vpop.f32.mrf.mxu0  ;;  %v862_v40 = vld [vmem:[%s2194_s9 + $0x78] sm:$0xff] }
 0x769   :  { %1615 = vpow2.f32 %v1158_v41  ;;  %v845_v41 = vld [vmem:[%s2193_s8 + $0x70] sm:$0xff] }
 0x76a   :  { %v1412_v43 = vpop.f32.mrf.mxu0  ;;  %v861_v42 = vld [vmem:[%s2194_s9 + $0x70] sm:$0xff] }
 0x76b   :  { %v844_v43 = vld [vmem:[%s2193_s8 + $0x68] sm:$0xff] }
 0x776   :  { %v1616_v44 = vpop.eup %1615 }
 0x777   :  { %v632_v45 = vadd.f32 1.0, %v1616_v44  ;;  %v860_v44 = vld [vmem:[%s2194_s9 + $0x68] sm:$0xff] }
 0x779   :  { %1617 = vrcp.f32 %v632_v45  ;;  %v843_v45 = vld [vmem:[%s2193_s8 + $0x60] sm:$0xff] }
 0x786   :  { %v1618_v46 = vpop.eup %1617 }
 0x787   :  { %635 = vrot.lane.b32.xlu1 %v1618_v46, %s1669_s22  ;;  %637 = vrot.lane.b32.xlu0 %v1618_v46, %s1668_s21 }
 0x78b   :  { %641 = vrot.lane.b32.xlu0 %v1618_v46, %s1667_s20 }
 0x7f9   :  { %v638_v47 = vpop.permute.xlu0 %637  ;;  %v636_v21 = vpop.permute.xlu1 %635 }
 0x7fa   :  { %v639_v48 = vmul.f32 2.0, %v638_v47  ;;  %v643_v50 = vmul.f32 %v636_v21, %v584_v32 }
 0x7fc   :  { %v1159_v49 = vadd.f32 -1.0, %v639_v48 }
 0x7fd   :  { %v642_v56 = vpop.permute.xlu0 %641 }
 0x7fe   :  { %v644_v51 = vmul.f32 %v1618_v46, %v1159_v49  ;;  %v274_v46 = vadd.f32 %v1910_v22, %v1877_v53  ;;  %v841_v22 = vld [vmem:[%s2193_s8 + $0x50] sm:$0xff] }
 0x800   :  { %v645_v54 = vadd.f32 %v644_v51, %v643_v50 }
 0x802   :  { %1619 = vtanh.f32 %v645_v54 }
 0x80f   :  { %v1620_v55 = vpop.eup %1619 }
 0x810   :  { %v647_v57 = vmul.f32 %v1620_v55, %v642_v56  ;;  %v859_v56 = vld [vmem:[%s2194_s9 + $0x60] sm:$0xff] }
 0x812   :  { %v648_v58 = vpack.c.bf16 %v647_v57, %v647_v57  ;;  %v842_v57 = vld [vmem:[%s2193_s8 + $0x58] sm:$0xff] }
 0x814   :  { %1430 = vmatmul.mubr.bf16.vlgmr.msra.gmra.mxu1 %v648_v58  ;;  %v857_v58 = vld [vmem:[%s2194_s9 + $0x50] sm:$0xff] }
 0x815   :  { %1454 = vmatpush3.bf16.msra.mxu1 %v1755_v5  ;;  %1469 = vmatprep.mubr.msk.bf16.mxu1 %vm1666_vm2, %v1665_v4  ;;  %v266_v5 = vadd.f32 %v1877_v53, %v1912_v23  ;;  %v858_v53 = vld [vmem:[%s2194_s9 + $0x58] sm:$0xff] }
 0x816   :  { %1455 = vmatprep.subr.bf16.mxu1 %v1665_v4 }
 0x819   :  { %1456 = vmatpush3.bf16.msra.mxu1 %v1760_v6 }
 0x81a   :  { %1457 = vmatprep.subr.bf16.mxu1 %v1665_v4 }
 0x81d   :  { %1458 = vmatpush3.bf16.msra.mxu1 %v1770_v7 }
 0x81e   :  { %1459 = vmatprep.subr.bf16.mxu1 %v1665_v4 }
 0x821   :  { %1460 = vmatpush3.bf16.msra.mxu1 %v1777_v8 }
 0x822   :  { %1461 = vmatprep.subr.bf16.mxu1 %v1665_v4 }
 0x825   :  { %1462 = vmatpush3.bf16.msra.mxu1 %v1790_v11 }
 0x826   :  { %1463 = vmatprep.subr.bf16.mxu1 %v1665_v4 }
 0x829   :  { %1464 = vmatpush3.bf16.msra.mxu1 %v1801_v13 }
 0x82a   :  { %1465 = vmatprep.subr.bf16.mxu1 %v1665_v4 }
 0x82d   :  { %1466 = vmatpush3.bf16.msra.mxu1 %v1813_v15 }
 0x82e   :  { %1467 = vmatprep.subr.bf16.mxu1 %v1665_v4 }
 0x831   :  { %1468 = vmatpush3.bf16.msra.mxu1 %v1821_v16 }
 0x832   :  { %1508 = vmatprep.subr.mxu1 %v1665_v4 }
 0x8d4   :  { %v683_v6 = vpop.f32.mrf.mxu1 }
 0x8d5   :  { %v689_v7 = vadd.f32 %v683_v6, %v266_v5  ;;  %v840_v5 = vld [vmem:[%s2193_s8 + $0x48] sm:$0xff] }
 0x8d6   :  { %v1431_v8 = vpop.f32.mrf.mxu1  ;;  %v856_v6 = vld [vmem:[%s2194_s9 + $0x48] sm:$0xff] }
 0x8d7   :  { %v1160_v11 = vmul.f32 -1.442695, %v689_v7  ;;  %v839_v7 = vld [vmem:[%s2193_s8 + $0x40] sm:$0xff] }
 0x8d8   :  { %v686_v52 = vpop.f32.mrf.mxu1  ;;  %v855_v8 = vld [vmem:[%s2194_s9 + $0x40] sm:$0xff] }
 0x8d9   :  { %1621 = vpow2.f32 %v1160_v11  ;;  %v838_v11 = vld [vmem:[%s2193_s8 + $0x38] sm:$0xff] }
 0x8da   :  { %v1432_v13 = vpop.f32.mrf.mxu1  ;;  %v854_v52 = vld [vmem:[%s2194_s9 + $0x38] sm:$0xff] }
 0x8db   :  { %v837_v13 = vld [vmem:[%s2193_s8 + $0x30] sm:$0xff] }
 0x8e6   :  { %v1622_v59 = vpop.eup %1621 }
 0x8e7   :  { %v693_v60 = vadd.f32 1.0, %v1622_v59 }
 0x8e9   :  { %1623 = vrcp.f32 %v693_v60  ;;  %v853_v60 = vld [vmem:[%s2194_s9 + $0x30] sm:$0xff] }
 0x8f6   :  { %v1624_v15 = vpop.eup %1623 }
 0x8f7   :  { %696 = vrot.lane.b32.xlu0 %v1624_v15, %s1669_s22  ;;  %698 = vrot.lane.b32.xlu1 %v1624_v15, %s1668_s21 }
 0x8fb   :  { %702 = vrot.lane.b32.xlu1 %v1624_v15, %s1667_s20 }
 0x969   :  { %v699_v16 = vpop.permute.xlu1 %698  ;;  %v697_v23 = vpop.permute.xlu0 %696 }
 0x96a   :  { %v700_v61 = vmul.f32 2.0, %v699_v16  ;;  %v704_v63 = vmul.f32 %v697_v23, %v645_v54  ;;  %v852_v16 = vld [vmem:[%s2194_s9 + $0x28] sm:$0xff]  ;;  %v851_v23 = vld [vmem:[%s2194_s9 + $0x20] sm:$0xff] }
 0x96c   :  { %v1161_v62 = vadd.f32 -1.0, %v700_v61  ;;  %v835_v61 = vld [vmem:[%s2193_s8 + $0x20] sm:$0xff] }
 0x96d   :  { %v703_v3 = vpop.permute.xlu1 %702 }
 0x96e   :  { %v705_v0 = vmul.f32 %v1624_v15, %v1161_v62  ;;  %v836_v15 = vld [vmem:[%s2193_s8 + $0x28] sm:$0xff]  ;;  %v834_v62 = vld [vmem:[%s2193_s8 + $0x18] sm:$0xff] }
 0x970   :  { %v706_v1 = vadd.f32 %v705_v0, %v704_v63  ;;  %v850_v63 = vld [vmem:[%s2194_s9 + $0x18] sm:$0xff]  ;;  %v833_v0 = vld [vmem:[%s2193_s8 + $0x10] sm:$0xff] }
 0x972   :  { %1625 = vtanh.f32 %v706_v1 }
 0x97f   :  { %v1626_v2 = vpop.eup %1625 }
 0x980   :  { %v708_v9 = vmul.f32 %v1626_v2, %v703_v3  ;;  %v832_v2 = vld [vmem:[%s2193_s8 + $0x8] sm:$0xff] }
 0x981   :  { %v848_v3 = vld [vmem:[%s2194_s9 + $0x8] sm:$0xff] }
 0x982   :  { %v709_v10 = vpack.c.bf16 %v708_v9, %v708_v9  ;;  %v831_v9 = vld [vmem:[%s2193_s8] sm:$0xff] }
 0x984   :  { %1450 = vmatmul.mubr.bf16.vlgmr.msra.gmra.mxu0 %v709_v10  ;;  %v847_v10 = vld [vmem:[%s2194_s9] sm:$0xff] }
 0x985   :  { %1505 = vmatprep.mubr.msk.f32.mxu0 %vm1666_vm2, %v1665_v4  ;;  %1474 = vmatpush3.msra.mxu0 %v862_v40 }
 0x986   :  { %1475 = vmatprep.subr.mxu0 %v1665_v4 }
 0x987   :  { %1476 = vmatpush3.msra.mxu0 %v861_v42 }
 0x988   :  { %1477 = vmatprep.subr.mxu0 %v1665_v4 }
 0x989   :  { %1478 = vmatpush3.msra.mxu0 %v860_v44 }
 0x98a   :  { %1479 = vmatprep.subr.mxu0 %v1665_v4 }
 0x98b   :  { %1480 = vmatpush3.msra.mxu0 %v859_v56 }
 0x98c   :  { %1481 = vmatprep.subr.mxu0 %v1665_v4 }
 0x98d   :  { %1482 = vmatpush3.msra.mxu0 %v858_v53 }
 0x98e   :  { %1483 = vmatprep.subr.mxu0 %v1665_v4 }
 0x98f   :  { %1484 = vmatpush3.msra.mxu0 %v857_v58 }
 0x990   :  { %1485 = vmatprep.subr.mxu0 %v1665_v4 }
 0x991   :  { %1486 = vmatpush3.msra.mxu0 %v856_v6 }
 0x992   :  { %1487 = vmatprep.subr.mxu0 %v1665_v4 }
 0x993   :  { %1488 = vmatpush3.msra.mxu0 %v855_v8 }
 0x994   :  { %1489 = vmatprep.subr.mxu0 %v1665_v4 }
 0x995   :  { %1490 = vmatpush3.msra.mxu0 %v854_v52 }
 0x996   :  { %1491 = vmatprep.subr.mxu0 %v1665_v4 }
 0x997   :  { %1492 = vmatpush3.msra.mxu0 %v853_v60 }
 0x998   :  { %1493 = vmatprep.subr.mxu0 %v1665_v4 }
 0x999   :  { %1494 = vmatpush3.msra.mxu0 %v852_v16 }
 0x99a   :  { %1495 = vmatprep.subr.mxu0 %v1665_v4 }
 0x99b   :  { %1496 = vmatpush3.msra.mxu0 %v851_v23 }
 0x99c   :  { %1497 = vmatprep.subr.mxu0 %v1665_v4 }
 0x99d   :  { %1498 = vmatpush3.msra.mxu0 %v850_v63 }
 0x99e   :  { %1499 = vmatprep.subr.mxu0 %v1665_v4 }
 0xa44   :  { %v744_v14 = vpop.f32.mrf.mxu0 }
 0xa45   :  { %v750_v17 = vadd.f32 %v744_v14, %v271_v12 }
 0xa46   :  { %v1451_v19 = vpop.f32.mrf.mxu0 }
 0xa47   :  { %v1162_v24 = vmul.f32 -1.442695, %v750_v17 }
 0xa48   :  { %v747_v25 = vpop.f32.mrf.mxu0 }
 0xa49   :  { %1627 = vpow2.f32 %v1162_v24 }
 0xa4a   :  { %v1452_v26 = vpop.f32.mrf.mxu0 }
 0xa56   :  { %v1628_v27 = vpop.eup %1627 }
 0xa57   :  { %v754_v28 = vadd.f32 1.0, %v1628_v27 }
 0xa59   :  { %1629 = vrcp.f32 %v754_v28 }
 0xa66   :  { %v1630_v18 = vpop.eup %1629 }
 0xa67   :  { %757 = vrot.lane.b32.xlu1 %v1630_v18, %s1669_s22  ;;  %759 = vrot.lane.b32.xlu0 %v1630_v18, %s1668_s21 }
 0xa6b   :  { %763 = vrot.lane.b32.xlu0 %v1630_v18, %s1667_s20 }
 0xad9   :  { %v760_v29 = vpop.permute.xlu0 %759  ;;  %v758_v20 = vpop.permute.xlu1 %757 }
 0xada   :  { %v761_v30 = vmul.f32 2.0, %v760_v29  ;;  %v765_v32 = vmul.f32 %v758_v20, %v706_v1  ;;  %v849_v1 = vld [vmem:[%s2194_s9 + $0x10] sm:$0xff] }
 0xadb   :  { %1500 = vmatpush3.msra.mxu0 %v849_v1  ;;  %v1017_v20 = vld [vmem:[%s2196_s11 + $0x10] sm:$0xff] }
 0xadc   :  { %v1163_v31 = vadd.f32 -1.0, %v761_v30  ;;  %1501 = vmatprep.subr.mxu0 %v1665_v4  ;;  %v1018_v30 = vld [vmem:[%s2196_s11 + $0x18] sm:$0xff] }
 0xadd   :  { %v764_v36 = vpop.permute.xlu0 %763  ;;  %1502 = vmatpush3.msra.mxu0 %v848_v3 }
 0xade   :  { %v766_v33 = vmul.f32 %v1630_v18, %v1163_v31  ;;  %1503 = vmatprep.subr.mxu0 %v1665_v4  ;;  %v1016_v31 = vld [vmem:[%s2196_s11 + $0x8] sm:$0xff] }
 0xadf   :  { %1504 = vmatpush3.msra.mxu0 %v847_v10 }
 0xae0   :  { %v2017_v34 = vadd.f32 %v766_v33, %v765_v32  ;;  %1543 = vmatprep.subr.mxu0 %v1665_v4  ;;  %v1015_v32 = vld [vmem:[%s2196_s11] sm:$0xff] }
 0xae2   :  { %1631 = vtanh.f32 %v2017_v34 }
 0xaef   :  { %v1632_v35 = vpop.eup %1631 }
 0xaf0   :  { %v769_v37 = vmul.f32 %v1632_v35, %v764_v36  ;;  %v1166_v35 = vld [vmem:[%s2195_s10] ss:$0 sm:$0xff]  ;;  %s1670_s10 = smov [#allocation2]  }
 0xaf1   :  { %s1118_s11 = sshll.u32 %s1670_s10, 4  ;;  %s1119_s11 = int_to_ptr.vmem [resolvable:$true] %s1118_s11 }
 0xaf2   :  { %v770_v38 = vpack.c.bf16 %v769_v37, %v769_v37  ;;  %p1648_p1 = scmp.lt.s32.totalorder %s1119_s11, %s1119_s11 }
 0xaf4   :  { %1470 = vmatmul.mubr.bf16.vlgmr.msra.gmra.mxu1 %v770_v38 }
 0xaf5   :  { %1540 = vmatprep.mubr.msk.f32.mxu1 %vm1666_vm2, %v1665_v4  ;;  %1509 = vmatpush3.msra.mxu1 %v846_v39 }
 0xaf6   :  { %1510 = vmatprep.subr.mxu1 %v1665_v4 }
 0xaf7   :  { %1511 = vmatpush3.msra.mxu1 %v845_v41 }
 0xaf8   :  { %1512 = vmatprep.subr.mxu1 %v1665_v4 }
 0xaf9   :  { %1513 = vmatpush3.msra.mxu1 %v844_v43 }
 0xafa   :  { %1514 = vmatprep.subr.mxu1 %v1665_v4 }
 0xafb   :  { %1515 = vmatpush3.msra.mxu1 %v843_v45 }
 0xafc   :  { %1516 = vmatprep.subr.mxu1 %v1665_v4 }
 0xafd   :  { %1517 = vmatpush3.msra.mxu1 %v842_v57 }
 0xafe   :  { %1518 = vmatprep.subr.mxu1 %v1665_v4 }
 0xaff   :  { %1519 = vmatpush3.msra.mxu1 %v841_v22 }
 0xb00   :  { %1520 = vmatprep.subr.mxu1 %v1665_v4 }
 0xb01   :  { %1521 = vmatpush3.msra.mxu1 %v840_v5 }
 0xb02   :  { %1522 = vmatprep.subr.mxu1 %v1665_v4 }
 0xb03   :  { %1523 = vmatpush3.msra.mxu1 %v839_v7 }
 0xb04   :  { %1524 = vmatprep.subr.mxu1 %v1665_v4 }
 0xb05   :  { %1525 = vmatpush3.msra.mxu1 %v838_v11 }
 0xb06   :  { %1526 = vmatprep.subr.mxu1 %v1665_v4 }
 0xb07   :  { %1527 = vmatpush3.msra.mxu1 %v837_v13 }
 0xb08   :  { %1528 = vmatprep.subr.mxu1 %v1665_v4 }
 0xb09   :  { %1529 = vmatpush3.msra.mxu1 %v836_v15 }
 0xb0a   :  { %1530 = vmatprep.subr.mxu1 %v1665_v4 }
 0xb0b   :  { %1531 = vmatpush3.msra.mxu1 %v835_v61 }
 0xb0c   :  { %1532 = vmatprep.subr.mxu1 %v1665_v4 }
 0xb0d   :  { %1533 = vmatpush3.msra.mxu1 %v834_v62 }
 0xb0e   :  { %1534 = vmatprep.subr.mxu1 %v1665_v4 }
 0xb0f   :  { %1535 = vmatpush3.msra.mxu1 %v833_v0 }
 0xb10   :  { %1536 = vmatprep.subr.mxu1 %v1665_v4 }
 0xb11   :  { %1537 = vmatpush3.msra.mxu1 %v832_v2 }
 0xb12   :  { %1538 = vmatprep.subr.mxu1 %v1665_v4 }
 0xb13   :  { %1539 = vmatpush3.msra.mxu1 %v831_v9 }
 0xbb4   :  { %v805_v47 = vpop.f32.mrf.mxu1 }
 0xbb5   :  { %v811_v48 = vadd.f32 %v805_v47, %v274_v46 }
 0xbb6   :  { %v1471_v21 = vpop.f32.mrf.mxu1 }
 0xbb7   :  { %v1164_v49 = vmul.f32 -1.442695, %v811_v48 }
 0xbb8   :  { %v808_v50 = vpop.f32.mrf.mxu1 }
 0xbb9   :  { %1633 = vpow2.f32 %v1164_v49 }
 0xbba   :  { %v1472_v51 = vpop.f32.mrf.mxu1 }
 0xbc6   :  { %v1634_v54 = vpop.eup %1633 }
 0xbc7   :  { %v815_v55 = vadd.f32 1.0, %v1634_v54 }
 0xbc9   :  { %1635 = vrcp.f32 %v815_v55 }
 0xbd6   :  { %v1636_v59 = vpop.eup %1635 }
 0xbd7   :  { %818 = vrot.lane.b32.xlu0 %v1636_v59, %s1669_s22  ;;  %820 = vrot.lane.b32.xlu1 %v1636_v59, %s1668_s21 }
 0xbdb   :  { %824 = vrot.lane.b32.xlu1 %v1636_v59, %s1667_s20 }
 0xc49   :  { %v821_v12 = vpop.permute.xlu1 %820  ;;  %v819_v17 = vpop.permute.xlu0 %818 }
 0xc4a   :  { %v822_v14 = vmul.f32 2.0, %v821_v12  ;;  %v826_v24 = vmul.f32 %v819_v17, %v2017_v34 }
 0xc4c   :  { %v1165_v19 = vadd.f32 -1.0, %v822_v14 }
 0xc4d   :  { %v825_v28 = vpop.permute.xlu1 %824 }
 0xc4e   :  { %v827_v25 = vmul.f32 %v1636_v59, %v1165_v19 }
 0xc50   :  { %v828_v26 = vadd.f32 %v827_v25, %v826_v24 }
 0xc52   :  { %1637 = vtanh.f32 %v828_v26 }
 0xc5f   :  { %v1638_v27 = vpop.eup %1637 }
 0xc60   :  { %v830_v18 = vmul.f32 %v1638_v27, %v825_v28 }
 0xc62   :  { %v864_v29 = vrot.slane %v830_v18, 2  ;;  %1541 = vmatmul.mubr.f32.vlgmr.msra.gmra.mxu1 %v830_v18 }
 0xc64   :  { %1506 = vmatmul.mubr.f32.vlgmr.msra.gmra.mxu0 %v864_v29 }
 0xc65   :  { %1551 = vmatprep.mubr.msk.f32.mxu0 %vm1666_vm2, %v1665_v4  ;;  %1544 = vmatpush3.msra.mxu0 %v1018_v30 }
 0xc66   :  { %1545 = vmatprep.subr.mxu0 %v1665_v4 }
 0xc67   :  { %1546 = vmatpush3.msra.mxu0 %v1017_v20 }
 0xc68   :  { %1547 = vmatprep.subr.mxu0 %v1665_v4 }
 0xc69   :  { %1548 = vmatpush3.msra.mxu0 %v1016_v31 }
 0xc6a   :  { %1549 = vmatprep.subr.mxu0 %v1665_v4  ;;  %v1167_v4 = vld [vmem:[%s2197_s12] ss:$0 sm:$0xff]  ;;  %s1643_s12 = scalar_lea.vmem %s1119_s11, 32 }
 0xc6b   :  { %1550 = vmatpush3.msra.mxu0 %v1015_v32  ;;  %p1644_p0 = scmp.ne.s32.totalorder %s1119_s11, %s1643_s12  ;;  %p1649_p2 = scmp.lt.s32.totalorder %s1643_s12, %s1643_s12 }
 0xc6d   :  { %p1650_p3 = por %p1649_p2, %p1648_p1 }
 0xc6f   :  { %p1651_p4 = pnand %p1650_p3, %p1644_p0 }
 0xd22   :  { %v1002_v33 = vpop.f32.mrf.mxu1 }
 0xd24   :  { %v932_v34 = vpop.f32.mrf.mxu0  ;;  %v1542_v36 = vpop.f32.mrf.mxu1 }
 0xd25   :  { %v1003_v37 = vadd.f32 %v1002_v33, %v932_v34 }
 0xd26   :  { %v1507_v38 = vpop.f32.mrf.mxu0 }
 0xd27   :  { %v1013_v39 = vadd.f32 %v1166_v35, %v1003_v37 }
 0xd29   :  { %v1014_v40 = vmax.f32 %v1013_v39, 0.0 }
 0xd2b   :  { %1552 = vmatmul.mubr.msk.f32.vlgmr.msra.gmra.mxu0 %vm199_vm3, %v1014_v40 }
 0xdeb   :  { %v1095_v41 = vpop.f32.mrf.mxu0 }
 0xdec   :  { %v1096_v42 = vadd.f32 %v1167_v4, %v1095_v41 }
 0xded   :  { %v1553_v43 = vpop.f32.mrf.mxu0 }
 0xdee   :  { %v1100_v44 = vsel %vm1099_vm4, %v1096_v42, -inf }
 0xdef   :  { %1101 = vmax.xlane.f32.xlu0 %v1100_v44 }
 0xe78   :  { %v1102_v45 = vpop.xlane.xlu0 %1101 }
 0xe79   :  { %v1103_v46 = vsub.f32 %v1096_v42, %v1102_v45 }
 0xe7b   :  { %v1104_v47 = vmul.f32 1.442695, %v1103_v46 }
 0xe7d   :  { %1639 = vpow2.f32 %v1104_v47 }
 0xe8a   :  { %v1640_v48 = vpop.eup %1639 }
 0xe8b   :  { %v1106_v21 = vsel %vm1099_vm4, %v1640_v48, 0.0 }
 0xe8c   :  { %1107 = vadd.xlane.f32.xlu1 %v1106_v21 }
 0xf15   :  { %v1108_v49 = vpop.xlane.xlu1 %1107 }
 0xf16   :  { %1641 = vrcp.f32 %v1108_v49 }
 0xf23   :  { %v1642_v50 = vpop.eup %1641 }
 0xf24   :  { %v1110_v51 = vmul.f32 %v1642_v50, %v1640_v48 }
 0xf26   :  { %1111 = vst.msk [vmem:[#allocation2] sm:$0x3] %vm1099_vm4, %v1110_v51 }
 0xf27   :  { %1654 = shalt.err (!%p1651_p4)
}
 0xf28   :  { %1121 = dma.vmem_to_hbm [thread:$0]  %s1119_s11, 32, %s2198_s13, [#allocation3]  }
 0xf29   :  { %1663 = dma.done.wait [#allocation3], 32  }
 0xf2a   :  { %1664 = vsyncadd [#allocation3], 4294967264 }
 0xf2b   :  { %1125 = vsyncpa [#allocation3], 1 }

</bundles_post_ra>
